<compile_context>
chip_gen: v5e
topology: v5e:2x2
jax: 0.10.0
libtpu: 0.0.40
codegen_flags: <defaults>
</compile_context>

<pallas_src>
import functools

import jax
import jax.numpy as jnp
from jax.experimental import pallas as pl
from jax.experimental.pallas import tpu as pltpu

_LANE = 128
_SUBLANE = 8

# Tile caps sized so the worst-case double-buffered working set fits v7x's
# 64 MiB VMEM per TensorCore while being big enough to amortize the ~0.35us
# grid-step overhead and the weight/x HBM streams on v5e/v6e.
_TM_CAP = 512
_TK_CAP = 1024
_TN_CAP = 2048
_X_RESIDENT_BYTES = 8 << 20   # 2 buffers of the resident x row-block
_VMEM_FLOOR = 32 << 20
_VMEM_CEIL = 48 << 20         # safe on v7x (64 MiB physical), fine on v5e/v6e


def _round_up(a, m):
    return -(-a // m) * m


def _pick_tile(dim_lane, cap):
    """Lane-multiple tile <= cap minimizing padding of dim_lane (prefers larger)."""
    if dim_lane <= cap:
        return dim_lane, dim_lane
    best_t, best_pad = None, None
    t = cap
    while t >= _LANE:
        pad = _round_up(dim_lane, t)
        if best_pad is None or pad < best_pad:
            best_t, best_pad = t, pad
        t -= _LANE
    return best_t, best_pad


def _pick_tm(m):
    """Row tile: minimize M padding waste; prefer larger tiles on ties."""
    m8 = _round_up(m, _SUBLANE)
    if m8 <= _TM_CAP:
        return m8, m8
    best_t, best_pad = None, None
    for t in (_TM_CAP, 384, 256, 128):
        pad = _round_up(m8, t)
        if best_pad is None or pad < best_pad:
            best_t, best_pad = t, pad
    return best_t, best_pad


def _plan_kn(K, N):
    k_lane = _round_up(K, _LANE)
    n_lane = _round_up(N, _LANE)
    tk, k_pad = _pick_tile(k_lane, _TK_CAP)
    tn, n_pad = _pick_tile(n_lane, _TN_CAP)
    return tk, tn, k_pad, n_pad


def fc_layer_kernel(x_ref, wt_ref, b_ref, o_ref, *scratch, tk):
    # x_ref : (tm, tk) or VMEM-resident (tm, K_pad) bf16 row-block (tanh done in wrapper)
    # wt_ref: (tk, tn) bf16 pre-transposed weight tile
    # b_ref : (1, tn)  f32 bias tile
    # o_ref : (tm, tn) output tile; doubles as the f32 accumulator when the
    #         output dtype is f32 (output block is resident across the k axis)
    # scratch: optional (tm, tn) f32 accumulator when the output dtype is not f32
    k = pl.program_id(2)
    acc_ref = scratch[0] if scratch else o_ref

    @pl.when(k == 0)
    def _init():
        # Seed the accumulator with the broadcast bias: no epilogue bias add.
        acc_ref[...] = jnp.zeros_like(acc_ref) + b_ref[...]

    if x_ref.shape[-1] == tk:
        xk = x_ref[...]
    else:
        # Resident x row-block: slice the current lane-aligned K chunk.
        off = pl.multiple_of(k * tk, _LANE)
        xk = x_ref[:, pl.ds(off, tk)]

    # bf16 MXU operands, f32 accumulation.
    acc_ref[...] += jnp.dot(xk, wt_ref[...], preferred_element_type=jnp.float32)

    if scratch:
        @pl.when(k == pl.num_programs(2) - 1)
        def _store():
            o_ref[...] = acc_ref[...].astype(o_ref.dtype)


def prepare_fc_params(weight, bias, *, compute_dtype=jnp.bfloat16):
    """Transpose + zero-pad + cast nn.Linear params ONCE at init time.

    weight: (output_dim, input_dim), bias: (output_dim,)
    Returns (wt, b): wt (K_pad, N_pad) compute_dtype, b (1, N_pad) f32.
    """
    N, K = weight.shape
    _, _, k_pad, n_pad = _plan_kn(K, N)
    wt = jnp.zeros((k_pad, n_pad), compute_dtype)
    wt = wt.at[:K, :N].set(weight.T.astype(compute_dtype))
    b = jnp.zeros((1, n_pad), jnp.float32)
    b = b.at[:, :N].set(bias.reshape(1, N).astype(jnp.float32))
    return wt, b


def fc_layer_apply(x, wt, b, output_dim, *, use_activation=True):
    """x: (M, input_dim); wt/b from prepare_fc_params(). Returns (M, output_dim)."""
    M, K = x.shape
    tk, tn, k_pad, n_pad = _plan_kn(K, output_dim)
    assert wt.shape == (k_pad, n_pad) and b.shape == (1, n_pad), \
        "params must come from prepare_fc_params() with matching dims"

    tm, m_pad = _pick_tm(M)
    out_dtype = x.dtype
    use_scratch = jnp.dtype(out_dtype) != jnp.dtype(jnp.float32)

    # Hoist dropout(identity) / tanh / bf16 cast / zero-pad out of the per-step
    # kernel path. tanh stays in f32 (v5e has no bf16 EUP); tanh(0)=0 and the
    # padded weight rows/cols are zero, so padding never changes real outputs.
    # TODO(synk): dropout with p>0 in training mode would need pltpu.prng_* masking.
    xh = x
    if use_activation:
        xh = jnp.tanh(xh.astype(jnp.float32))
    xh = xh.astype(wt.dtype)
    if (m_pad, k_pad) != (M, K):
        xp = jnp.zeros((m_pad, k_pad), wt.dtype).at[:M, :K].set(xh)
    else:
        xp = xh

    x_bytes = jnp.dtype(wt.dtype).itemsize
    out_bytes = jnp.dtype(out_dtype).itemsize

    # Keep the x row-block resident in VMEM across j and k when it fits:
    # Pallas skips the re-DMA when the block index (i, 0) does not change.
    x_resident = 2 * tm * k_pad * x_bytes <= _X_RESIDENT_BYTES
    if x_resident:
        x_spec = pl.BlockSpec((tm, k_pad), lambda i, j, k: (i, 0))
        x_cols = k_pad
    else:
        x_spec = pl.BlockSpec((tm, tk), lambda i, j, k: (i, k))
        x_cols = tk

    need = (2 * tm * x_cols * x_bytes          # x (double-buffered)
            + 2 * tk * tn * x_bytes            # weight (double-buffered, bf16)
            + 2 * _SUBLANE * tn * 4            # bias (sublane-padded)
            + 2 * tm * tn * out_bytes          # output (double-buffered)
            + (tm * tn * 4 if use_scratch else 0))
    vmem_limit = int(min(max(int(1.4 * need), _VMEM_FLOOR), _VMEM_CEIL))

    grid = (m_pad // tm, n_pad // tn, k_pad // tk)
    scratch_shapes = [pltpu.VMEM((tm, tn), jnp.float32)] if use_scratch else []

    out_p = pl.pallas_call(
        functools.partial(fc_layer_kernel, tk=tk),
        out_shape=jax.ShapeDtypeStruct((m_pad, n_pad), out_dtype),
        grid_spec=pltpu.PrefetchScalarGridSpec(
            num_scalar_prefetch=0,
            grid=grid,
            in_specs=[
                x_spec,
                pl.BlockSpec((tk, tn), lambda i, j, k: (k, j)),
                pl.BlockSpec((1, tn), lambda i, j, k: (0, j)),
            ],
            out_specs=pl.BlockSpec((tm, tn), lambda i, j, k: (i, j)),
            scratch_shapes=scratch_shapes,
        ),
        compiler_params=pltpu.CompilerParams(
            dimension_semantics=("parallel", "parallel", "arbitrary"),
            vmem_limit_bytes=vmem_limit,
        ),
    )(xp, wt, b)

    return out_p[:M, :output_dim]


def fc_layer(x, weight, bias, *, use_activation=True, compute_dtype=jnp.bfloat16):
    """Convenience one-shot wrapper. Under jit, prefer prepare_fc_params() once
    at init + fc_layer_apply() per call so the weight transform isn't repeated."""
    wt, b = prepare_fc_params(weight, bias, compute_dtype=compute_dtype)
    return fc_layer_apply(x, wt, b, weight.shape[0], use_activation=use_activation)


if __name__ == "__main__":
    key = jax.random.PRNGKey(0)
    kx, kw, kb = jax.random.split(key, 3)

    batch = 8
    input_dim = 32
    output_dim = 64

    x = jax.random.normal(kx, (batch, input_dim), dtype=jnp.float32)
    # Deterministic synthetic parameters (nn.Linear shapes: W (out,in), b (out,))
    bound = 1.0 / float(input_dim) ** 0.5
    weight = jax.random.uniform(
        kw, (output_dim, input_dim), minval=-bound, maxval=bound, dtype=jnp.float32
    )
    bias = jax.random.uniform(
        kb, (output_dim,), minval=-bound, maxval=bound, dtype=jnp.float32
    )

    # Prepare params once (transpose/pad/cast), then run the Pallas kernel.
    wt_p, b_p = prepare_fc_params(weight, bias)
    out = fc_layer_apply(x, wt_p, b_p, output_dim, use_activation=True)
    out = jax.block_until_ready(out)
    assert out.shape == (batch, output_dim)

    # Tight check vs. a reference using the same bf16-operand / f32-accum math.
    ref_bf16 = (
        jnp.dot(
            jnp.tanh(x).astype(jnp.bfloat16),
            weight.T.astype(jnp.bfloat16),
            preferred_element_type=jnp.float32,
        )
        + bias
    )
    assert jnp.allclose(out, ref_bf16, atol=2e-3, rtol=2e-3), "mismatch vs bf16 reference"

    # Loose check vs. full-f32 math (bounds the bf16 quantization error).
    ref_f32 = jnp.tanh(x) @ weight.T + bias
    assert jnp.allclose(out, ref_f32, atol=5e-2, rtol=5e-2), "mismatch vs f32 reference"

    print("KERNEL_OK")
</pallas_src>

<mosaic_0001>
module attributes {stable_mosaic.version = 11 : i64} {
  func.func @fc_layer_kernel(%arg0: i32, %arg1: i32, %arg2: i32, %arg3: memref<8x128xbf16, #tpu.memory_space<vmem>>, %arg4: memref<128x128xbf16, #tpu.memory_space<vmem>>, %arg5: memref<1x128xf32, #tpu.memory_space<vmem>>, %arg6: memref<8x128xf32, #tpu.memory_space<vmem>>) attributes {dimension_semantics = [#tpu.dimension_semantics<parallel>, #tpu.dimension_semantics<parallel>, #tpu.dimension_semantics<arbitrary>], iteration_bounds = array<i64: 1, 1, 1>, scalar_prefetch = 0 : i64, scratch_operands = 0 : i64, tpu.core_type = #tpu.core_type<tc>, window_params = [{transform_indices = @transform_0, window_bounds = array<i64: 8, 128>}, {transform_indices = @transform_1, window_bounds = array<i64: 128, 128>}, {transform_indices = @transform_2, window_bounds = array<i64: 1, 128>}, {transform_indices = @transform_3, window_bounds = array<i64: 8, 128>}]} {
    %c0_i32 = arith.constant 0 : i32
    %0 = arith.cmpi eq, %arg2, %c0_i32 : i32
    %1 = arith.extui %0 : i1 to i32
    %c0_i32_0 = arith.constant 0 : i32
    %2 = arith.cmpi ne, %1, %c0_i32_0 : i32
    scf.if %2 {
      %cst_8 = arith.constant 0.000000e+00 : f32
      %9 = vector.broadcast %cst_8 : f32 to vector<8x128xf32>
      %c0_9 = arith.constant 0 : index
      %c0_10 = arith.constant 0 : index
      %10 = vector.load %arg5[%c0_9, %c0_10] : memref<1x128xf32, #tpu.memory_space<vmem>>, vector<1x128xf32>
      %11 = vector.broadcast %10 : vector<1x128xf32> to vector<8x128xf32>
      %12 = arith.addf %9, %11 : vector<8x128xf32>
      %c0_11 = arith.constant 0 : index
      %c0_12 = arith.constant 0 : index
      %13 = vector.load %arg6[%c0_11, %c0_12] : memref<8x128xf32, #tpu.memory_space<vmem>>, vector<8x128xf32>
      tpu.vector_store %arg6[%c0_11, %c0_12], %12 {strides = array<i32>} : memref<8x128xf32, #tpu.memory_space<vmem>>, vector<8x128xf32>,
    } else {
    }
    %c0 = arith.constant 0 : index
    %c0_1 = arith.constant 0 : index
    %3 = vector.load %arg3[%c0, %c0_1] : memref<8x128xbf16, #tpu.memory_space<vmem>>, vector<8x128xbf16>
    %c0_2 = arith.constant 0 : index
    %c0_3 = arith.constant 0 : index
    %4 = vector.load %arg6[%c0_2, %c0_3] : memref<8x128xf32, #tpu.memory_space<vmem>>, vector<8x128xf32>
    %c0_4 = arith.constant 0 : index
    %c0_5 = arith.constant 0 : index
    %5 = vector.load %arg4[%c0_4, %c0_5] : memref<128x128xbf16, #tpu.memory_space<vmem>>, vector<128x128xbf16>
    %cst = arith.constant dense<0.000000e+00> : vector<8x128xf32>
    %6 = tpu.matmul %3, %5, %cst {dimension_numbers = #tpu.dot_dimension_numbers<[1], [0], [0], [1], [0, 0, 1, 1], [], []>} : vector<8x128xbf16>, vector<128x128xbf16>, vector<8x128xf32> -> vector<8x128xf32>
    %7 = arith.addf %4, %6 : vector<8x128xf32>
    %c0_6 = arith.constant 0 : index
    %c0_7 = arith.constant 0 : index
    %8 = vector.load %arg6[%c0_6, %c0_7] : memref<8x128xf32, #tpu.memory_space<vmem>>, vector<8x128xf32>
    tpu.vector_store %arg6[%c0_6, %c0_7], %7 {strides = array<i32>} : memref<8x128xf32, #tpu.memory_space<vmem>>, vector<8x128xf32>,
    return
  }
  func.func @transform_0(%arg0: i32, %arg1: i32, %arg2: i32) -> (i32, i32) {
    %c0_i32 = arith.constant 0 : i32
    %c0_i32_0 = arith.constant 0 : i32
    return %arg0, %c0_i32 : i32, i32
  }
  func.func @transform_1(%arg0: i32, %arg1: i32, %arg2: i32) -> (i32, i32) {
    %c0_i32 = arith.constant 0 : i32
    return %arg2, %arg1 : i32, i32
  }
  func.func @transform_2(%arg0: i32, %arg1: i32, %arg2: i32) -> (i32, i32) {
    %c0_i32 = arith.constant 0 : i32
    %c0_i32_0 = arith.constant 0 : i32
    return %c0_i32, %arg1 : i32, i32
  }
  func.func @transform_3(%arg0: i32, %arg1: i32, %arg2: i32) -> (i32, i32) {
    %c0_i32 = arith.constant 0 : i32
    return %arg0, %arg1 : i32, i32
  }
}

</mosaic_0001>

<bundles_post_ra>
// kernel: tpu_custom_call.1
= control target key start
LH: loop header
LB: loop body
LE: loop exit
PB: predicated region body
PF: predicated region fallthrough
CT: control target
= control target key end

     0   :  { %8 = vsyncpa [#allocation3], 0  ;;  %s315_s0 = inlined_call_operand.hbm [shape: bf16[8,128], index: 0, kind: input, shape index: {}]   ;;  %s316_s1 = inlined_call_operand.hbm [shape: bf16[128,128], index: 1, kind: input, shape index: {}]   ;;  %s317_s2 = inlined_call_operand.vmem [shape: f32[1,128], index: 2, kind: input, shape index: {}]   ;;  %s318_s3 = inlined_call_operand.hbm [shape: f32[8,128], index: 3, kind: output, shape index: {}]  }
   0x1   :  { %9 = vsyncpa [#allocation6], 0 }
   0x2   :  { %10 = vsyncpa [#allocation4], 0  ;;  %s16_s14 = sshll.u32 %s315_s0, 4  ;;  %s278_s15 = smov [#allocation2]   ;;  %s17_s14 = int_to_ptr.hbm [resolvable:$true] %s16_s14 }
   0x3   :  { %s18_s16 = sshll.u32 %s278_s15, 4  ;;  %s26_s19 = sshll.u32 %s316_s1, 4  ;;  %s19_s16 = int_to_ptr.vmem [resolvable:$true] %s18_s16  ;;  %s27_s19 = int_to_ptr.hbm [resolvable:$true] %s26_s19 }
   0x4   :  { %21 = dma.hbm_to_vmem [thread:$0]  %s17_s14, 64, %s19_s16, [#allocation3]  }
   0x5   :  { %s279_s20 = smov [#allocation5]   ;;  %s280_s22 = smov 64  }
   0x6   :  { %s28_s21 = sshll.u32 %s279_s20, 4  ;;  %s281_s23 = smov 4   ;;  %s29_s21 = int_to_ptr.vmem [resolvable:$true] %s28_s21 }
   0x7   :  { %34 = dma.hbm_to_vmem [thread:$0]  %s27_s19, 1024, %s29_s21, [#allocation6], %s280_s22, %s280_s22, %s281_s23  }
   0x8   :  { %272 = dma.done.wait [#allocation3], 64  }
   0x9   :  { %273 = vsyncadd [#allocation3], 4294967232 }
   0xa   :  { %274 = dma.done.wait [#allocation6], 1024  }
   0xb   :  { %275 = vsyncadd [#allocation6], 4294966272  ;;  %v193_v0 = vld [vmem:[#allocation5 + $0x38] sm:$0xff]  ;;  %v192_v1 = vld [vmem:[#allocation5 + $0x30] sm:$0xff]  ;;  %s282_s24 = smov [#allocation7]   ;;  %s143_s28 = sshll.u32 %s318_s3, 4  ;;  %s144_s28 = int_to_ptr.hbm [resolvable:$true] %s143_s28 }
   0xc   :  { %121 = vmatpush.bf16.msra.mxu0 %v193_v0  ;;  %v191_v2 = vld [vmem:[#allocation5 + $0x28] sm:$0xff]  ;;  %v190_v3 = vld [vmem:[#allocation5 + $0x20] sm:$0xff]  ;;  %v189_v4 = vld [vmem:[#allocation5 + $0x18] sm:$0xff]  ;;  %s141_s25 = sshll.u32 %s282_s24, 4  ;;  %s142_s25 = int_to_ptr.vmem [resolvable:$true] %s141_s25 }
   0xd   :  { %v188_v5 = vld [vmem:[#allocation5 + $0x10] sm:$0xff]  ;;  %v187_v6 = vld [vmem:[#allocation5 + $0x8] sm:$0xff]  ;;  %v186_v7 = vld [vmem:[#allocation5] sm:$0xff] }
   0xe   :  { %v55_v8 = vld [vmem:[#allocation2] sm:$0xf] }
   0xf   :  { %v199_v9 = vld [vmem:[%s317_s2] ss:$0 sm:$0xff] }
  0x10   :  { %122 = vmatpush.bf16.msra.mxu0 %v192_v1 }
  0x14   :  { %123 = vmatpush.bf16.msra.mxu0 %v191_v2 }
  0x18   :  { %124 = vmatpush.bf16.msra.mxu0 %v190_v3 }
  0x1c   :  { %125 = vmatpush.bf16.msra.mxu0 %v189_v4 }
  0x20   :  { %126 = vmatpush.bf16.msra.mxu0 %v188_v5 }
  0x24   :  { %127 = vmatpush.bf16.msra.mxu0 %v187_v6 }
  0x28   :  { %128 = vmatpush.bf16.msra.mxu0 %v186_v7 }
  0x2b   :  { %129 = vmatmul.bf16.vlgmr.msra.gmra.mxu0 %v55_v8 }
  0xa8   :  { %v130_v10 = vpop.f32.mrf.mxu0 }
  0xa9   :  { %v134_v11 = vadd.f32 %v199_v9, %v130_v10 }
  0xab   :  { %135 = vst [vmem:[#allocation7] sm:$0xff] %v134_v11 }
  0xac   :  { %146 = dma.vmem_to_hbm [thread:$0]  %s142_s25, 128, %s144_s28, [#allocation4]  }
  0xb0   :  { %v132_v12 = vpop.f32.mrf.mxu0 }
  0xb1   :  { %276 = dma.done.wait [#allocation4], 128  }
  0xb2   :  { %277 = vsyncadd [#allocation4], 4294967168 }
  0xb3   :  { %151 = vsyncpa [#allocation3], 1 }
  0xb4   :  { %152 = vsyncpa [#allocation6], 1 }
  0xb5   :  { %153 = vsyncpa [#allocation4], 1 }

</bundles_post_ra>
